<compile_context>
chip_gen: v6e
topology: v6e:2x2x1
jax: 0.10.0
libtpu: 0.0.40
codegen_flags: <defaults>
</compile_context>

<pallas_src>
import jax
import jax.numpy as jnp
from jax.experimental import pallas as pl
from jax.experimental.pallas import tpu as pltpu

INPUT_SIZE = 13 * 52          # 676
OUTPUT_SIZE = 10 * 1          # 10
HIDDEN_SIZE = 128             # trial.suggest_int('hidden_size', 64, 512)
NUM_LAYERS = 2                # trial.suggest_int('num_layers', 1, 3)
DROPOUT_RATE = 0.25           # trial.suggest_float('dropout', 0.1, 0.5) -- identity in eval

OUT_PAD = 128                 # 10 padded up to 128 (lane-dense output / MXU N)
MAX_BLK_B = 1024              # 1024x676 f32 tile ~= 2.6 MiB; double-buffered ~5.3 MiB


def _round_up(n, m):
    return (n + m - 1) // m * m


def _pick_block(b):
    """Batch tile size: >=2 grid steps for non-tiny batches (v7x TC sharding +
    DMA/compute overlap), sublane-aligned, capped so VMEM stays small."""
    if b <= 64:
        return _round_up(b, 8)            # tiny batch: one step, minimal traffic
    half = pl.cdiv(b, 2)                  # aim for an even 2-way split
    return min(MAX_BLK_B, _round_up(half, 8))


def _mlp_kernel(x_ref, w1_ref, b1_ref, w2_ref, b2_ref, w3_ref, b3_ref, o_ref):
    """Fused MLP forward for one batch tile: (Linear+ReLU) x2 -> Linear.

    Weights/biases are VMEM-resident across grid steps (constant index_map);
    only the x tile and output tile stream through the pipeline.
    """
    h = jnp.dot(x_ref[...], w1_ref[...], preferred_element_type=jnp.float32)
    h = jnp.maximum(h + b1_ref[...], 0.0)          # bias + ReLU (Dropout(eval) == id)

    h = jnp.dot(h, w2_ref[...], preferred_element_type=jnp.float32)
    h = jnp.maximum(h + b2_ref[...], 0.0)          # bias + ReLU (Dropout(eval) == id)

    out = jnp.dot(h, w3_ref[...], preferred_element_type=jnp.float32)
    o_ref[...] = (out + b3_ref[...]).astype(o_ref.dtype)


@jax.jit
def mymodel_forward(x, padded_params):
    """x: (B, 13, 52) float32 -> (B, 10) float32."""
    b = x.shape[0]
    w1, b1, w2, b2, w3, b3 = padded_params   # only w3/b3 are lane-padded (see pad_params)

    x2d = x.reshape(b, -1)                   # x.view(x.size(0), -1) -- no padding, no copy op

    blk_b = _pick_block(b)
    grid = (pl.cdiv(b, blk_b),)              # uneven last block handled by Pallas

    flops = 2 * b * (INPUT_SIZE * HIDDEN_SIZE
                     + HIDDEN_SIZE * HIDDEN_SIZE
                     + HIDDEN_SIZE * OUT_PAD)
    bytes_accessed = 4 * (b * INPUT_SIZE + b * OUT_PAD
                          + INPUT_SIZE * HIDDEN_SIZE + HIDDEN_SIZE * HIDDEN_SIZE
                          + HIDDEN_SIZE * OUT_PAD + 2 * HIDDEN_SIZE + OUT_PAD)

    out_padded = pl.pallas_call(
        _mlp_kernel,
        out_shape=jax.ShapeDtypeStruct((b, OUT_PAD), jnp.float32),
        grid=grid,
        in_specs=[
            pl.BlockSpec((blk_b, INPUT_SIZE), lambda i: (i, 0)),         # x tile (streams, K=676 native)
            pl.BlockSpec((INPUT_SIZE, HIDDEN_SIZE), lambda i: (0, 0)),   # w1 (resident, unpadded)
            pl.BlockSpec((1, HIDDEN_SIZE), lambda i: (0, 0)),            # b1
            pl.BlockSpec((HIDDEN_SIZE, HIDDEN_SIZE), lambda i: (0, 0)),  # w2
            pl.BlockSpec((1, HIDDEN_SIZE), lambda i: (0, 0)),            # b2
            pl.BlockSpec((HIDDEN_SIZE, OUT_PAD), lambda i: (0, 0)),      # w3 (padded N)
            pl.BlockSpec((1, OUT_PAD), lambda i: (0, 0)),                # b3 (padded N)
        ],
        out_specs=pl.BlockSpec((blk_b, OUT_PAD), lambda i: (i, 0)),
        compiler_params=pltpu.CompilerParams(
            dimension_semantics=("parallel",)),  # shard batch tiles across TCs (v7x)
        cost_estimate=pl.CostEstimate(
            flops=flops, transcendentals=0, bytes_accessed=bytes_accessed),
    )(x2d, w1, b1, w2, b2, w3, b3)

    return out_padded[:, :OUTPUT_SIZE]


def init_params(key):
    """Deterministic PyTorch-style (uniform +/- 1/sqrt(fan_in)) init."""
    def linear(key, fan_in, fan_out):
        kw, kb = jax.random.split(key)
        bound = 1.0 / jnp.sqrt(fan_in)
        w = jax.random.uniform(kw, (fan_in, fan_out), jnp.float32, -bound, bound)
        b = jax.random.uniform(kb, (1, fan_out), jnp.float32, -bound, bound)
        return w, b

    k1, k2, k3 = jax.random.split(key, 3)
    w1, b1 = linear(k1, INPUT_SIZE, HIDDEN_SIZE)
    w2, b2 = linear(k2, HIDDEN_SIZE, HIDDEN_SIZE)
    w3, b3 = linear(k3, HIDDEN_SIZE, OUTPUT_SIZE)
    return (w1, b1, w2, b2, w3, b3)


def pad_params(params):
    """One-time, numerically-exact zero padding of the final layer only
    (lane-dense output).  w1 and x are NOT padded (saves HBM traffic)."""
    w1, b1, w2, b2, w3, b3 = params
    w3p = jnp.zeros((HIDDEN_SIZE, OUT_PAD), jnp.float32).at[:, :OUTPUT_SIZE].set(w3)
    b3p = jnp.zeros((1, OUT_PAD), jnp.float32).at[:, :OUTPUT_SIZE].set(b3)
    return (w1, b1, w2, b2, w3p, b3p)


def reference_forward(x, params):
    """Pure-JAX reference for correctness check (unpadded params)."""
    w1, b1, w2, b2, w3, b3 = params
    h = x.reshape(x.shape[0], -1)
    h = jnp.maximum(h @ w1 + b1, 0.0)
    h = jnp.maximum(h @ w2 + b2, 0.0)
    return h @ w3 + b3


if __name__ == "__main__":
    key = jax.random.PRNGKey(0)
    kx, kp = jax.random.split(key)

    batch = 8
    x = jax.random.normal(kx, (batch, 13, 52), dtype=jnp.float32)
    params = init_params(kp)
    padded = pad_params(params)

    out = mymodel_forward(x, padded)
    jax.block_until_ready(out)

    ref = reference_forward(x, params)
    assert out.shape == (batch, OUTPUT_SIZE)
    assert jnp.allclose(out, ref, atol=1e-4, rtol=1e-4), "mismatch vs reference"

    print("KERNEL_OK")
</pallas_src>

<mosaic_0001>
module attributes {stable_mosaic.version = 11 : i64} {
  func.func @_mlp_kernel(%arg0: i32, %arg1: memref<8x676xf32, #tpu.memory_space<vmem>>, %arg2: memref<676x128xf32, #tpu.memory_space<vmem>>, %arg3: memref<1x128xf32, #tpu.memory_space<vmem>>, %arg4: memref<128x128xf32, #tpu.memory_space<vmem>>, %arg5: memref<1x128xf32, #tpu.memory_space<vmem>>, %arg6: memref<128x128xf32, #tpu.memory_space<vmem>>, %arg7: memref<1x128xf32, #tpu.memory_space<vmem>>, %arg8: memref<8x128xf32, #tpu.memory_space<vmem>>) attributes {dimension_semantics = [#tpu.dimension_semantics<parallel>], iteration_bounds = array<i64: 1>, scalar_prefetch = 0 : i64, scratch_operands = 0 : i64, tpu.core_type = #tpu.core_type<tc>, window_params = [{transform_indices = @transform_0, window_bounds = array<i64: 8, 676>}, {pipeline_mode = #tpu.pipeline_mode<synchronous>, transform_indices = @transform_1, window_bounds = array<i64: 676, 128>}, {pipeline_mode = #tpu.pipeline_mode<synchronous>, transform_indices = @transform_2, window_bounds = array<i64: 1, 128>}, {pipeline_mode = #tpu.pipeline_mode<synchronous>, transform_indices = @transform_3, window_bounds = array<i64: 128, 128>}, {pipeline_mode = #tpu.pipeline_mode<synchronous>, transform_indices = @transform_4, window_bounds = array<i64: 1, 128>}, {pipeline_mode = #tpu.pipeline_mode<synchronous>, transform_indices = @transform_5, window_bounds = array<i64: 128, 128>}, {pipeline_mode = #tpu.pipeline_mode<synchronous>, transform_indices = @transform_6, window_bounds = array<i64: 1, 128>}, {transform_indices = @transform_7, window_bounds = array<i64: 8, 128>}]} {
    %c0 = arith.constant 0 : index
    %c0_0 = arith.constant 0 : index
    %0 = vector.load %arg1[%c0, %c0_0] : memref<8x676xf32, #tpu.memory_space<vmem>>, vector<8x676xf32>
    %c0_1 = arith.constant 0 : index
    %c0_2 = arith.constant 0 : index
    %1 = vector.load %arg2[%c0_1, %c0_2] : memref<676x128xf32, #tpu.memory_space<vmem>>, vector<676x128xf32>
    %cst = arith.constant dense<0.000000e+00> : vector<8x128xf32>
    %2 = tpu.matmul %0, %1, %cst {dimension_numbers = #tpu.dot_dimension_numbers<[1], [0], [0], [1], [0, 0, 1, 1], [], []>} : vector<8x676xf32>, vector<676x128xf32>, vector<8x128xf32> -> vector<8x128xf32>
    %c0_3 = arith.constant 0 : index
    %c0_4 = arith.constant 0 : index
    %3 = vector.load %arg3[%c0_3, %c0_4] : memref<1x128xf32, #tpu.memory_space<vmem>>, vector<1x128xf32>
    %4 = vector.broadcast %3 : vector<1x128xf32> to vector<8x128xf32>
    %5 = arith.addf %2, %4 : vector<8x128xf32>
    %cst_5 = arith.constant 0.000000e+00 : f32
    %6 = vector.broadcast %cst_5 : f32 to vector<8x128xf32>
    %7 = arith.maximumf %5, %6 : vector<8x128xf32>
    %c0_6 = arith.constant 0 : index
    %c0_7 = arith.constant 0 : index
    %8 = vector.load %arg4[%c0_6, %c0_7] : memref<128x128xf32, #tpu.memory_space<vmem>>, vector<128x128xf32>
    %cst_8 = arith.constant dense<0.000000e+00> : vector<8x128xf32>
    %9 = tpu.matmul %7, %8, %cst_8 {dimension_numbers = #tpu.dot_dimension_numbers<[1], [0], [0], [1], [0, 0, 1, 1], [], []>} : vector<8x128xf32>, vector<128x128xf32>, vector<8x128xf32> -> vector<8x128xf32>
    %c0_9 = arith.constant 0 : index
    %c0_10 = arith.constant 0 : index
    %10 = vector.load %arg5[%c0_9, %c0_10] : memref<1x128xf32, #tpu.memory_space<vmem>>, vector<1x128xf32>
    %11 = vector.broadcast %10 : vector<1x128xf32> to vector<8x128xf32>
    %12 = arith.addf %9, %11 : vector<8x128xf32>
    %cst_11 = arith.constant 0.000000e+00 : f32
    %13 = vector.broadcast %cst_11 : f32 to vector<8x128xf32>
    %14 = arith.maximumf %12, %13 : vector<8x128xf32>
    %c0_12 = arith.constant 0 : index
    %c0_13 = arith.constant 0 : index
    %15 = vector.load %arg6[%c0_12, %c0_13] : memref<128x128xf32, #tpu.memory_space<vmem>>, vector<128x128xf32>
    %cst_14 = arith.constant dense<0.000000e+00> : vector<8x128xf32>
    %16 = tpu.matmul %14, %15, %cst_14 {dimension_numbers = #tpu.dot_dimension_numbers<[1], [0], [0], [1], [0, 0, 1, 1], [], []>} : vector<8x128xf32>, vector<128x128xf32>, vector<8x128xf32> -> vector<8x128xf32>
    %c0_15 = arith.constant 0 : index
    %c0_16 = arith.constant 0 : index
    %17 = vector.load %arg7[%c0_15, %c0_16] : memref<1x128xf32, #tpu.memory_space<vmem>>, vector<1x128xf32>
    %18 = vector.broadcast %17 : vector<1x128xf32> to vector<8x128xf32>
    %19 = arith.addf %16, %18 : vector<8x128xf32>
    %c0_17 = arith.constant 0 : index
    %c0_18 = arith.constant 0 : index
    %20 = vector.load %arg8[%c0_17, %c0_18] : memref<8x128xf32, #tpu.memory_space<vmem>>, vector<8x128xf32>
    tpu.vector_store %arg8[%c0_17, %c0_18], %19 {strides = array<i32>} : memref<8x128xf32, #tpu.memory_space<vmem>>, vector<8x128xf32>,
    return
  }
  func.func @transform_0(%arg0: i32) -> (i32, i32) {
    %c0_i32 = arith.constant 0 : i32
    %c0_i32_0 = arith.constant 0 : i32
    return %arg0, %c0_i32 : i32, i32
  }
  func.func @transform_1(%arg0: i32) -> (i32, i32) {
    %c0_i32 = arith.constant 0 : i32
    %c0_i32_0 = arith.constant 0 : i32
    %c0_i32_1 = arith.constant 0 : i32
    return %c0_i32, %c0_i32_0 : i32, i32
  }
  func.func @transform_2(%arg0: i32) -> (i32, i32) {
    %c0_i32 = arith.constant 0 : i32
    %c0_i32_0 = arith.constant 0 : i32
    %c0_i32_1 = arith.constant 0 : i32
    return %c0_i32, %c0_i32_0 : i32, i32
  }
  func.func @transform_3(%arg0: i32) -> (i32, i32) {
    %c0_i32 = arith.constant 0 : i32
    %c0_i32_0 = arith.constant 0 : i32
    %c0_i32_1 = arith.constant 0 : i32
    return %c0_i32, %c0_i32_0 : i32, i32
  }
  func.func @transform_4(%arg0: i32) -> (i32, i32) {
    %c0_i32 = arith.constant 0 : i32
    %c0_i32_0 = arith.constant 0 : i32
    %c0_i32_1 = arith.constant 0 : i32
    return %c0_i32, %c0_i32_0 : i32, i32
  }
  func.func @transform_5(%arg0: i32) -> (i32, i32) {
    %c0_i32 = arith.constant 0 : i32
    %c0_i32_0 = arith.constant 0 : i32
    %c0_i32_1 = arith.constant 0 : i32
    return %c0_i32, %c0_i32_0 : i32, i32
  }
  func.func @transform_6(%arg0: i32) -> (i32, i32) {
    %c0_i32 = arith.constant 0 : i32
    %c0_i32_0 = arith.constant 0 : i32
    %c0_i32_1 = arith.constant 0 : i32
    return %c0_i32, %c0_i32_0 : i32, i32
  }
  func.func @transform_7(%arg0: i32) -> (i32, i32) {
    %c0_i32 = arith.constant 0 : i32
    %c0_i32_0 = arith.constant 0 : i32
    return %arg0, %c0_i32 : i32, i32
  }
}

</mosaic_0001>

<bundles_post_ra>
// kernel: mymodel_forward.1
= control target key start
LH: loop header
LB: loop body
LE: loop exit
PB: predicated region body
PF: predicated region fallthrough
CT: control target
= control target key end

     0   :  { %12 = vsyncpa [#allocation3], 0  ;;  %s1022_s0 = inlined_call_operand.vmem [shape: f32[8,676], index: 0, kind: input, shape index: {}]   ;;  %s1023_s1 = inlined_call_operand.hbm [shape: f32[676,128], index: 1, kind: input, shape index: {}]   ;;  %s1024_s2 = inlined_call_operand.vmem [shape: f32[1,128], index: 2, kind: input, shape index: {}]   ;;  %s1025_s3 = inlined_call_operand.vmem [shape: f32[128,128], index: 3, kind: input, shape index: {}]   ;;  %s1026_s4 = inlined_call_operand.vmem [shape: f32[1,128], index: 4, kind: input, shape index: {}]   ;;  %s1027_s5 = inlined_call_operand.vmem [shape: f32[128,128], index: 5, kind: input, shape index: {}]   ;;  %s1028_s6 = inlined_call_operand.vmem [shape: f32[1,128], index: 6, kind: input, shape index: {}]   ;;  %s1029_s7 = inlined_call_operand.hbm [shape: f32[8,128], index: 7, kind: output, shape index: {}]  }
   0x1   :  { %13 = vsyncpa [#allocation4], 0  ;;  %s790_s24 = smov [#allocation2]  }
   0x2   :  { %s21_s25 = sshll.u32 %s790_s24, 4  ;;  %s22_s25 = int_to_ptr.vmem [resolvable:$true] %s21_s25 }
   0x3   :  { %s754_s26 = scalar_lea.vmem %s22_s25, 10880  ;;  %p759_p1 = scmp.lt.s32.totalorder %s22_s25, %s22_s25 }
   0x4   :  { %p755_p0 = scmp.ne.s32.totalorder %s22_s25, %s754_s26  ;;  %p760_p2 = scmp.lt.s32.totalorder %s754_s26, %s754_s26 }
   0x6   :  { %p761_p3 = por %p760_p2, %p759_p1 }
   0x8   :  { %p762_p4 = pnand %p761_p3, %p755_p0 }
   0xa   :  { %765 = shalt.err (!%p762_p4)
}
   0xb   :  { %s791_s27 = smov 128   ;;  %s792_s28 = smov 8  }
   0xc   :  { %27 = dma.hbm_to_vmem [thread:$0]  %s1023_s1, 10880, %s22_s25, [#allocation3], %s791_s27, %s791_s27, %s792_s28  }
   0xd   :  { %786 = dma.done.wait [#allocation3], 10880  }
   0xe   :  { %787 = vsyncadd [#allocation3], 4294956416  ;;  %v78_v0 = vld [vmem:[#allocation2 + $0xf8] sm:$0xff]  ;;  %v77_v2 = vld [vmem:[#allocation2 + $0xf0] sm:$0xff]  ;;  %vm139_vm0 = vcmask 293888   ;;  %vm143_vm1 = vcmask 1043456  }
   0xf   :  { %v62_v1 = vld [vmem:[#allocation2 + $0x78] sm:$0xff]  ;;  %566 = vmatprep.subr.mxu0 %v78_v0  ;;  %v61_v4 = vld [vmem:[#allocation2 + $0x70] sm:$0xff]  ;;  %v76_v6 = vld [vmem:[#allocation2 + $0xe8] sm:$0xff]  ;;  %vm794_vm2 = vmmov 0   ;;  %s795_s10 = smov [#allocation5]  }
  0x10   :  { %v110_v3 = vld [vmem:[#allocation2 + $0x1f8] sm:$0xff]  ;;  %567 = vmatpush3.msra.mxu0 %v62_v1  ;;  %v109_v7 = vld [vmem:[#allocation2 + $0x1f0] sm:$0xff]  ;;  %v60_v8 = vld [vmem:[#allocation2 + $0x68] sm:$0xff]  ;;  %s552_s11 = sshll.u32 %s795_s10, 4  ;;  %s553_s11 = int_to_ptr.vmem [resolvable:$true] %s552_s11 }
  0x11   :  { %v94_v5 = vld [vmem:[#allocation2 + $0x178] sm:$0xff]  ;;  %601 = vmatprep.subr.mxu1 %v110_v3  ;;  %568 = vmatprep.subr.mxu0 %v77_v2  ;;  %v93_v9 = vld [vmem:[#allocation2 + $0x170] sm:$0xff]  ;;  %v108_v10 = vld [vmem:[#allocation2 + $0x1e8] sm:$0xff]  ;;  %p771_p6 = scmp.lt.s32.totalorder %s553_s11, %s553_s11 }
  0x12   :  { %602 = vmatpush3.msra.mxu1 %v94_v5  ;;  %569 = vmatpush3.msra.mxu0 %v61_v4  ;;  %v75_v11 = vld [vmem:[#allocation2 + $0xe0] sm:$0xff]  ;;  %v92_v12 = vld [vmem:[#allocation2 + $0x168] sm:$0xff]  ;;  %v74_v15 = vld [vmem:[#allocation2 + $0xd8] sm:$0xff]  ;;  %v793_v5 = vmov 0.0  }
  0x13   :  { %603 = vmatprep.subr.mxu1 %v109_v7  ;;  %570 = vmatprep.subr.mxu0 %v76_v6  ;;  %v59_v13 = vld [vmem:[#allocation2 + $0x60] sm:$0xff]  ;;  %v58_v17 = vld [vmem:[#allocation2 + $0x58] sm:$0xff]  ;;  %v73_v19 = vld [vmem:[#allocation2 + $0xd0] sm:$0xff] }
  0x14   :  { %604 = vmatpush3.msra.mxu1 %v93_v9  ;;  %v107_v14 = vld [vmem:[#allocation2 + $0x1e0] sm:$0xff]  ;;  %571 = vmatpush3.msra.mxu0 %v60_v8  ;;  %v106_v18 = vld [vmem:[#allocation2 + $0x1d8] sm:$0xff]  ;;  %v57_v21 = vld [vmem:[#allocation2 + $0x50] sm:$0xff] }
  0x15   :  { %605 = vmatprep.subr.mxu1 %v108_v10  ;;  %v91_v16 = vld [vmem:[#allocation2 + $0x160] sm:$0xff]  ;;  %572 = vmatprep.subr.mxu0 %v75_v11  ;;  %v90_v20 = vld [vmem:[#allocation2 + $0x158] sm:$0xff]  ;;  %v105_v22 = vld [vmem:[#allocation2 + $0x1d0] sm:$0xff] }
  0x16   :  { %606 = vmatpush3.msra.mxu1 %v92_v12  ;;  %573 = vmatpush3.msra.mxu0 %v59_v13  ;;  %v72_v23 = vld [vmem:[#allocation2 + $0xc8] sm:$0xff]  ;;  %v89_v24 = vld [vmem:[#allocation2 + $0x150] sm:$0xff]  ;;  %v71_v27 = vld [vmem:[#allocation2 + $0xc0] sm:$0xff] }
  0x17   :  { %607 = vmatprep.subr.mxu1 %v107_v14  ;;  %574 = vmatprep.subr.mxu0 %v74_v15  ;;  %v56_v25 = vld [vmem:[#allocation2 + $0x48] sm:$0xff]  ;;  %v55_v29 = vld [vmem:[#allocation2 + $0x40] sm:$0xff]  ;;  %v70_v31 = vld [vmem:[#allocation2 + $0xb8] sm:$0xff] }
  0x18   :  { %608 = vmatpush3.msra.mxu1 %v91_v16  ;;  %575 = vmatpush3.msra.mxu0 %v58_v17  ;;  %v104_v26 = vld [vmem:[#allocation2 + $0x1c8] sm:$0xff]  ;;  %v103_v30 = vld [vmem:[#allocation2 + $0x1c0] sm:$0xff]  ;;  %v54_v33 = vld [vmem:[#allocation2 + $0x38] sm:$0xff] }
  0x19   :  { %609 = vmatprep.subr.mxu1 %v106_v18  ;;  %576 = vmatprep.subr.mxu0 %v73_v19  ;;  %v88_v28 = vld [vmem:[#allocation2 + $0x148] sm:$0xff]  ;;  %v87_v32 = vld [vmem:[#allocation2 + $0x140] sm:$0xff]  ;;  %v102_v34 = vld [vmem:[#allocation2 + $0x1b8] sm:$0xff] }
  0x1a   :  { %610 = vmatpush3.msra.mxu1 %v90_v20  ;;  %577 = vmatpush3.msra.mxu0 %v57_v21  ;;  %v69_v35 = vld [vmem:[#allocation2 + $0xb0] sm:$0xff]  ;;  %v86_v36 = vld [vmem:[#allocation2 + $0x138] sm:$0xff]  ;;  %v68_v39 = vld [vmem:[#allocation2 + $0xa8] sm:$0xff] }
  0x1b   :  { %611 = vmatprep.subr.mxu1 %v105_v22  ;;  %578 = vmatprep.subr.mxu0 %v72_v23  ;;  %v53_v37 = vld [vmem:[#allocation2 + $0x30] sm:$0xff]  ;;  %v52_v41 = vld [vmem:[#allocation2 + $0x28] sm:$0xff]  ;;  %v67_v43 = vld [vmem:[#allocation2 + $0xa0] sm:$0xff] }
  0x1c   :  { %612 = vmatpush3.msra.mxu1 %v89_v24  ;;  %579 = vmatpush3.msra.mxu0 %v56_v25  ;;  %v101_v38 = vld [vmem:[#allocation2 + $0x1b0] sm:$0xff]  ;;  %v100_v42 = vld [vmem:[#allocation2 + $0x1a8] sm:$0xff]  ;;  %v51_v45 = vld [vmem:[#allocation2 + $0x20] sm:$0xff] }
  0x1d   :  { %613 = vmatprep.subr.mxu1 %v104_v26  ;;  %580 = vmatprep.subr.mxu0 %v71_v27  ;;  %v85_v40 = vld [vmem:[#allocation2 + $0x130] sm:$0xff]  ;;  %v84_v44 = vld [vmem:[#allocation2 + $0x128] sm:$0xff]  ;;  %v99_v46 = vld [vmem:[#allocation2 + $0x1a0] sm:$0xff] }
  0x1e   :  { %614 = vmatpush3.msra.mxu1 %v88_v28  ;;  %581 = vmatpush3.msra.mxu0 %v55_v29  ;;  %v66_v47 = vld [vmem:[#allocation2 + $0x98] sm:$0xff]  ;;  %v83_v48 = vld [vmem:[#allocation2 + $0x120] sm:$0xff]  ;;  %v65_v51 = vld [vmem:[#allocation2 + $0x90] sm:$0xff] }
  0x1f   :  { %615 = vmatprep.subr.mxu1 %v103_v30  ;;  %582 = vmatprep.subr.mxu0 %v70_v31  ;;  %v50_v49 = vld [vmem:[#allocation2 + $0x18] sm:$0xff]  ;;  %v49_v53 = vld [vmem:[#allocation2 + $0x10] sm:$0xff]  ;;  %v64_v55 = vld [vmem:[#allocation2 + $0x88] sm:$0xff] }
  0x20   :  { %616 = vmatpush3.msra.mxu1 %v87_v32  ;;  %583 = vmatpush3.msra.mxu0 %v54_v33  ;;  %v98_v50 = vld [vmem:[#allocation2 + $0x198] sm:$0xff]  ;;  %v97_v54 = vld [vmem:[#allocation2 + $0x190] sm:$0xff]  ;;  %v48_v57 = vld [vmem:[#allocation2 + $0x8] sm:$0xff] }
  0x21   :  { %617 = vmatprep.subr.mxu1 %v102_v34  ;;  %584 = vmatprep.subr.mxu0 %v69_v35  ;;  %v82_v52 = vld [vmem:[#allocation2 + $0x118] sm:$0xff]  ;;  %v81_v56 = vld [vmem:[#allocation2 + $0x110] sm:$0xff]  ;;  %v96_v58 = vld [vmem:[#allocation2 + $0x188] sm:$0xff] }
  0x22   :  { %618 = vmatpush3.msra.mxu1 %v86_v36  ;;  %585 = vmatpush3.msra.mxu0 %v53_v37  ;;  %v63_v59 = vld [vmem:[#allocation2 + $0x80] sm:$0xff]  ;;  %v42_v60 = vld [vmem:[%s1022_s0 + $0x8] sm:$0xff]  ;;  %v44_v2 = vld [vmem:[%s1022_s0 + $0x18] sm:$0xff] }
  0x23   :  { %619 = vmatprep.subr.mxu1 %v101_v38  ;;  %586 = vmatprep.subr.mxu0 %v68_v39  ;;  %v47_v61 = vld [vmem:[#allocation2] sm:$0xff]  ;;  %v80_v62 = vld [vmem:[#allocation2 + $0x108] sm:$0xff]  ;;  %v126_v3 = vld [vmem:[#allocation2 + $0x278] sm:$0xff] }
  0x24   :  { %620 = vmatpush3.msra.mxu1 %v85_v40  ;;  %587 = vmatpush3.msra.mxu0 %v52_v41  ;;  %v41_v63 = vld [vmem:[%s1022_s0] sm:$0xff]  ;;  %v43_v4 = vld [vmem:[%s1022_s0 + $0x10] sm:$0xff]  ;;  %v46_v7 = vld [vmem:[%s1022_s0 + $0x28] sm:$0xff] }
  0x25   :  { %621 = vmatprep.subr.mxu1 %v100_v42  ;;  %588 = vmatprep.subr.mxu0 %v67_v43  ;;  %v95_v0 = vld [vmem:[#allocation2 + $0x180] sm:$0xff]  ;;  %v125_v6 = vld [vmem:[#allocation2 + $0x270] sm:$0xff]  ;;  %v124_v8 = vld [vmem:[#allocation2 + $0x268] sm:$0xff] }
  0x26   :  { %622 = vmatpush3.msra.mxu1 %v84_v44  ;;  %589 = vmatpush3.msra.mxu0 %v51_v45  ;;  %v79_v1 = vld [vmem:[#allocation2 + $0x100] sm:$0xff]  ;;  %v122_v10 = vld [vmem:[#allocation2 + $0x258] sm:$0xff]  ;;  %v121_v11 = vld [vmem:[#allocation2 + $0x250] sm:$0xff] }
  0x27   :  { %623 = vmatprep.subr.mxu1 %v99_v46  ;;  %590 = vmatprep.subr.mxu0 %v66_v47  ;;  %v123_v9 = vld [vmem:[#allocation2 + $0x260] sm:$0xff]  ;;  %v120_v12 = vld [vmem:[#allocation2 + $0x248] sm:$0xff]  ;;  %v118_v14 = vld [vmem:[#allocation2 + $0x238] sm:$0xff] }
  0x28   :  { %624 = vmatpush3.msra.mxu1 %v83_v48  ;;  %591 = vmatpush3.msra.mxu0 %v50_v49  ;;  %v119_v13 = vld [vmem:[#allocation2 + $0x240] sm:$0xff]  ;;  %v117_v15 = vld [vmem:[#allocation2 + $0x230] sm:$0xff]  ;;  %v116_v16 = vld [vmem:[#allocation2 + $0x228] sm:$0xff] }
  0x29   :  { %625 = vmatprep.subr.mxu1 %v98_v50  ;;  %592 = vmatprep.subr.mxu0 %v65_v51  ;;  %v115_v17 = vld [vmem:[#allocation2 + $0x220] sm:$0xff]  ;;  %v114_v18 = vld [vmem:[#allocation2 + $0x218] sm:$0xff]  ;;  %v113_v19 = vld [vmem:[#allocation2 + $0x210] sm:$0xff] }
  0x2a   :  { %626 = vmatpush3.msra.mxu1 %v82_v52  ;;  %593 = vmatpush3.msra.mxu0 %v49_v53  ;;  %v112_v20 = vld [vmem:[#allocation2 + $0x208] sm:$0xff]  ;;  %v111_v21 = vld [vmem:[#allocation2 + $0x200] sm:$0xff]  ;;  %v130_v23 = vld [vmem:[#allocation2 + $0x298] sm:$0xff] }
  0x2b   :  { %627 = vmatprep.subr.mxu1 %v97_v54  ;;  %594 = vmatprep.subr.mxu0 %v64_v55  ;;  %v131_v22 = vld [vmem:[#allocation2 + $0x2a0] sm:$0xf]  ;;  %v129_v24 = vld [vmem:[#allocation2 + $0x290] sm:$0xff]  ;;  %v128_v25 = vld [vmem:[#allocation2 + $0x288] sm:$0xff] }
  0x2c   :  { %628 = vmatpush3.msra.mxu1 %v81_v56  ;;  %595 = vmatpush3.msra.mxu0 %v48_v57  ;;  %v127_v26 = vld [vmem:[#allocation2 + $0x280] sm:$0xff]  ;;  %v373_v28 = vld [vmem:[%s1025_s3 + $0x78] sm:$0xff]  ;;  %v372_v29 = vld [vmem:[%s1025_s3 + $0x70] sm:$0xff] }
  0x2d   :  { %629 = vmatprep.subr.mxu1 %v96_v58  ;;  %596 = vmatprep.subr.mxu0 %v63_v59  ;;  %v45_v27 = vld [vmem:[%s1022_s0 + $0x20] sm:$0xff]  ;;  %v371_v30 = vld [vmem:[%s1025_s3 + $0x68] sm:$0xff]  ;;  %v369_v32 = vld [vmem:[%s1025_s3 + $0x58] sm:$0xff] }
  0x2e   :  { %211 = vmatprep.mubr.f32.mxu0 %v42_v60  ;;  %597 = vmatpush3.msra.mxu0 %v47_v61  ;;  %v370_v31 = vld [vmem:[%s1025_s3 + $0x60] sm:$0xff]  ;;  %v368_v33 = vld [vmem:[%s1025_s3 + $0x50] sm:$0xff]  ;;  %v367_v34 = vld [vmem:[%s1025_s3 + $0x48] sm:$0xff] }
  0x2f   :  { %630 = vmatpush3.msra.mxu1 %v80_v62  ;;  %212 = vmatmul.mubr.f32.vlgmr.msra.gmra.mxu0 %v41_v63  ;;  %v366_v35 = vld [vmem:[%s1025_s3 + $0x40] sm:$0xff]  ;;  %v365_v36 = vld [vmem:[%s1025_s3 + $0x38] sm:$0xff]  ;;  %v364_v37 = vld [vmem:[%s1025_s3 + $0x30] sm:$0xff] }
  0x30   :  { %631 = vmatprep.subr.mxu1 %v95_v0  ;;  %287 = vmatprep.subr.mxu0 %v793_v5  ;;  %v363_v38 = vld [vmem:[%s1025_s3 + $0x28] sm:$0xff]  ;;  %v362_v39 = vld [vmem:[%s1025_s3 + $0x20] sm:$0xff]  ;;  %v361_v40 = vld [vmem:[%s1025_s3 + $0x18] sm:$0xff] }
  0x31   :  { %632 = vmatpush3.msra.mxu1 %v79_v1  ;;  %281 = vmatprep.mubr.f32.mxu1 %v44_v2  ;;  %v360_v41 = vld [vmem:[%s1025_s3 + $0x10] sm:$0xff]  ;;  %v359_v42 = vld [vmem:[%s1025_s3 + $0x8] sm:$0xff]  ;;  %v358_v43 = vld [vmem:[%s1025_s3] sm:$0xff] }
  0x32   :  { %288 = vmatpush1.msra.mxu0 %v126_v3  ;;  %282 = vmatmul.mubr.f32.vlgmr.msra.gmra.mxu1 %v43_v4  ;;  %v561_v48 = vld [vmem:[%s1024_s2] ss:$0 sm:$0xff]  ;;  %v467_v57 = vld [vmem:[%s1027_s5 + $0x78] sm:$0xff]  ;;  %v466_v58 = vld [vmem:[%s1027_s5 + $0x70] sm:$0xff] }
  0x33   :  { %289 = vmatprep.subr.mxu0 %v793_v5  ;;  %563 = vmatprep.mubr.msk.f32.mxu0 %vm139_vm0, %v46_v7  ;;  %v465_v59 = vld [vmem:[%s1027_s5 + $0x68] sm:$0xff]  ;;  %v464_v60 = vld [vmem:[%s1027_s5 + $0x60] sm:$0xff]  ;;  %v463_v61 = vld [vmem:[%s1027_s5 + $0x58] sm:$0xff] }
  0x34   :  { %290 = vmatpush1.msra.mxu0 %v125_v6  ;;  %670 = vmatprep.subr.mxu1 %v793_v5  ;;  %v462_v62 = vld [vmem:[%s1027_s5 + $0x50] sm:$0xff]  ;;  %v461_v63 = vld [vmem:[%s1027_s5 + $0x48] sm:$0xff]  ;;  %v460_v0 = vld [vmem:[%s1027_s5 + $0x40] sm:$0xff] }
  0x35   :  { %291 = vmatprep.subr.mxu0 %v793_v5  ;;  %671 = vmatpush3.msra.mxu1 %v373_v28  ;;  %v459_v1 = vld [vmem:[%s1027_s5 + $0x38] sm:$0xff]  ;;  %v458_v2 = vld [vmem:[%s1027_s5 + $0x30] sm:$0xff]  ;;  %v457_v3 = vld [vmem:[%s1027_s5 + $0x28] sm:$0xff] }
  0x36   :  { %292 = vmatpush1.msra.mxu0 %v124_v8  ;;  %672 = vmatprep.subr.mxu1 %v793_v5  ;;  %v456_v4 = vld [vmem:[%s1027_s5 + $0x20] sm:$0xff]  ;;  %v455_v6 = vld [vmem:[%s1027_s5 + $0x18] sm:$0xff]  ;;  %v454_v7 = vld [vmem:[%s1027_s5 + $0x10] sm:$0xff] }
  0x37   :  { %293 = vmatprep.subr.mxu0 %v793_v5  ;;  %673 = vmatpush3.msra.mxu1 %v372_v29  ;;  %v453_v8 = vld [vmem:[%s1027_s5 + $0x8] sm:$0xff] }
  0x38   :  { %294 = vmatpush1.msra.mxu0 %v123_v9  ;;  %674 = vmatprep.subr.mxu1 %v793_v5  ;;  %v452_v9 = vld [vmem:[%s1027_s5] sm:$0xff]  ;;  %s766_s5 = scalar_lea.vmem %s553_s11, 128 }
  0x39   :  { %295 = vmatprep.subr.mxu0 %v793_v5  ;;  %675 = vmatpush3.msra.mxu1 %v371_v30  ;;  %p767_p5 = scmp.ne.s32.totalorder %s553_s11, %s766_s5  ;;  %p772_p7 = scmp.lt.s32.totalorder %s766_s5, %s766_s5 }
  0x3a   :  { %296 = vmatpush1.msra.mxu0 %v122_v10  ;;  %676 = vmatprep.subr.mxu1 %v793_v5  ;;  %v564_v10 = vld [vmem:[%s1026_s4] ss:$0 sm:$0xff] }
  0x3b   :  { %297 = vmatprep.subr.mxu0 %v793_v5  ;;  %677 = vmatpush3.msra.mxu1 %v370_v31  ;;  %p773_p8 = por %p772_p7, %p771_p6 }
  0x3c   :  { %298 = vmatpush1.msra.mxu0 %v121_v11  ;;  %678 = vmatprep.subr.mxu1 %v793_v5 }
  0x3d   :  { %299 = vmatprep.subr.mxu0 %v793_v5  ;;  %679 = vmatpush3.msra.mxu1 %v369_v32  ;;  %p774_p9 = pnand %p773_p8, %p767_p5 }
  0x3e   :  { %300 = vmatpush1.msra.mxu0 %v120_v12  ;;  %680 = vmatprep.subr.mxu1 %v793_v5 }
  0x3f   :  { %301 = vmatprep.subr.mxu0 %v793_v5  ;;  %681 = vmatpush3.msra.mxu1 %v368_v33 }
  0x40   :  { %302 = vmatpush1.msra.mxu0 %v119_v13  ;;  %682 = vmatprep.subr.mxu1 %v793_v5 }
  0x41   :  { %303 = vmatprep.subr.mxu0 %v793_v5  ;;  %683 = vmatpush3.msra.mxu1 %v367_v34 }
  0x42   :  { %304 = vmatpush1.msra.mxu0 %v118_v14  ;;  %684 = vmatprep.subr.mxu1 %v793_v5 }
  0x43   :  { %305 = vmatprep.subr.mxu0 %v793_v5  ;;  %685 = vmatpush3.msra.mxu1 %v366_v35 }
  0x44   :  { %306 = vmatpush1.msra.mxu0 %v117_v15  ;;  %686 = vmatprep.subr.mxu1 %v793_v5  ;;  %v565_v15 = vld [vmem:[%s1028_s6] ss:$0 sm:$0xff] }
  0x45   :  { %307 = vmatprep.subr.mxu0 %v793_v5  ;;  %687 = vmatpush3.msra.mxu1 %v365_v36 }
  0x46   :  { %308 = vmatpush1.msra.mxu0 %v116_v16  ;;  %688 = vmatprep.subr.mxu1 %v793_v5 }
  0x47   :  { %309 = vmatprep.subr.mxu0 %v793_v5  ;;  %689 = vmatpush3.msra.mxu1 %v364_v37 }
  0x48   :  { %310 = vmatpush1.msra.mxu0 %v115_v17  ;;  %690 = vmatprep.subr.mxu1 %v793_v5 }
  0x49   :  { %311 = vmatprep.subr.mxu0 %v793_v5  ;;  %691 = vmatpush3.msra.mxu1 %v363_v38 }
  0x4a   :  { %312 = vmatpush1.msra.mxu0 %v114_v18  ;;  %692 = vmatprep.subr.mxu1 %v793_v5 }
  0x4b   :  { %313 = vmatprep.subr.mxu0 %v793_v5  ;;  %693 = vmatpush3.msra.mxu1 %v362_v39 }
  0x4c   :  { %314 = vmatpush1.msra.mxu0 %v113_v19  ;;  %694 = vmatprep.subr.mxu1 %v793_v5 }
  0x4d   :  { %315 = vmatprep.subr.mxu0 %v793_v5  ;;  %695 = vmatpush3.msra.mxu1 %v361_v40 }
  0x4e   :  { %316 = vmatpush1.msra.mxu0 %v112_v20  ;;  %696 = vmatprep.subr.mxu1 %v793_v5 }
  0x4f   :  { %317 = vmatprep.subr.mxu0 %v793_v5  ;;  %697 = vmatpush3.msra.mxu1 %v360_v41 }
  0x50   :  { %318 = vmatpush1.msra.mxu0 %v111_v21  ;;  %698 = vmatprep.subr.mxu1 %v793_v5 }
  0x51   :  { %341 = vmatprep.subr.mxu0 %v793_v5  ;;  %699 = vmatpush3.msra.mxu1 %v359_v42 }
  0x52   :  { %562 = vmatpush2.msk.msra.mxu0 %vm143_vm1, %v131_v22  ;;  %700 = vmatprep.subr.mxu1 %v793_v5 }
  0x53   :  { %343 = vmatprep.subr.mxu0 %v793_v5  ;;  %701 = vmatpush3.msra.mxu1 %v358_v43 }
  0x54   :  { %344 = vmatpush2.msra.mxu0 %v130_v23  ;;  %702 = vmatprep.mubr.msk.f32.mxu1 %vm794_vm2, %v793_v5 }
  0x55   :  { %345 = vmatprep.subr.mxu0 %v793_v5  ;;  %705 = vmatprep.subr.mxu1 %v793_v5 }
  0x56   :  { %346 = vmatpush2.msra.mxu0 %v129_v24 }
  0x57   :  { %347 = vmatprep.subr.mxu0 %v793_v5 }
  0x58   :  { %348 = vmatpush2.msra.mxu0 %v128_v25 }
  0x59   :  { %349 = vmatprep.subr.mxu0 %v793_v5 }
  0x5a   :  { %350 = vmatpush2.msra.mxu0 %v127_v26 }
  0x5b   :  { %352 = vmatmul.mubr.f32.vlgmr.msra.gmra.mxu0 %v45_v27 }
  0xef   :  { %v598_v44 = vpop.f32.mrf.mxu0 }
  0xf1   :  { %v599_v45 = vpop.f32.mrf.mxu0 }
  0xf2   :  { %v633_v46 = vpop.f32.mrf.mxu1  ;;  %v600_v47 = vadd.f32 %v599_v45, %v598_v44 }
  0xf4   :  { %v634_v49 = vpop.f32.mrf.mxu1  ;;  %v214_v50 = vadd.f32 %v600_v47, %v561_v48 }
  0xf5   :  { %v635_v51 = vadd.f32 %v634_v49, %v633_v46 }
  0xf7   :  { %v284_v52 = vadd.f32 %v635_v51, %v214_v50 }
 0x11b   :  { %v353_v53 = vpop.f32.mrf.mxu0 }
 0x11c   :  { %v354_v54 = vadd.f32 %v353_v53, %v284_v52 }
 0x11d   :  { %v355_v55 = vpop.f32.mrf.mxu0 }
 0x11e   :  { %v357_v56 = vmax.f32 %v354_v54, 0.0 }
 0x120   :  { %703 = vmatmul.mubr.f32.vlgmr.msra.gmra.mxu1 %v357_v56 }
 0x121   :  { %706 = vmatpush3.msra.mxu1 %v467_v57  ;;  %737 = vmatprep.mubr.msk.f32.mxu1 %vm794_vm2, %v793_v5 }
 0x122   :  { %707 = vmatprep.subr.mxu1 %v793_v5 }
 0x123   :  { %708 = vmatpush3.msra.mxu1 %v466_v58 }
 0x124   :  { %709 = vmatprep.subr.mxu1 %v793_v5 }
 0x125   :  { %710 = vmatpush3.msra.mxu1 %v465_v59 }
 0x126   :  { %711 = vmatprep.subr.mxu1 %v793_v5 }
 0x127   :  { %712 = vmatpush3.msra.mxu1 %v464_v60 }
 0x128   :  { %713 = vmatprep.subr.mxu1 %v793_v5 }
 0x129   :  { %714 = vmatpush3.msra.mxu1 %v463_v61 }
 0x12a   :  { %715 = vmatprep.subr.mxu1 %v793_v5 }
 0x12b   :  { %716 = vmatpush3.msra.mxu1 %v462_v62 }
 0x12c   :  { %717 = vmatprep.subr.mxu1 %v793_v5 }
 0x12d   :  { %718 = vmatpush3.msra.mxu1 %v461_v63 }
 0x12e   :  { %719 = vmatprep.subr.mxu1 %v793_v5 }
 0x12f   :  { %720 = vmatpush3.msra.mxu1 %v460_v0 }
 0x130   :  { %721 = vmatprep.subr.mxu1 %v793_v5 }
 0x131   :  { %722 = vmatpush3.msra.mxu1 %v459_v1 }
 0x132   :  { %723 = vmatprep.subr.mxu1 %v793_v5 }
 0x133   :  { %724 = vmatpush3.msra.mxu1 %v458_v2 }
 0x134   :  { %725 = vmatprep.subr.mxu1 %v793_v5 }
 0x135   :  { %726 = vmatpush3.msra.mxu1 %v457_v3 }
 0x136   :  { %727 = vmatprep.subr.mxu1 %v793_v5 }
 0x137   :  { %728 = vmatpush3.msra.mxu1 %v456_v4 }
 0x138   :  { %729 = vmatprep.subr.mxu1 %v793_v5 }
 0x139   :  { %730 = vmatpush3.msra.mxu1 %v455_v6 }
 0x13a   :  { %731 = vmatprep.subr.mxu1 %v793_v5 }
 0x13b   :  { %732 = vmatpush3.msra.mxu1 %v454_v7 }
 0x13c   :  { %733 = vmatprep.subr.mxu1 %v793_v5 }
 0x13d   :  { %734 = vmatpush3.msra.mxu1 %v453_v8 }
 0x13e   :  { %735 = vmatprep.subr.mxu1 %v793_v5 }
 0x13f   :  { %736 = vmatpush3.msra.mxu1 %v452_v9 }
 0x1e0   :  { %v447_v11 = vpop.f32.mrf.mxu1 }
 0x1e1   :  { %v448_v12 = vadd.f32 %v564_v10, %v447_v11 }
 0x1e2   :  { %v704_v13 = vpop.f32.mrf.mxu1 }
 0x1e3   :  { %v451_v14 = vmax.f32 %v448_v12, 0.0 }
 0x1e5   :  { %738 = vmatmul.mubr.f32.vlgmr.msra.gmra.mxu1 %v451_v14 }
 0x2a5   :  { %v541_v5 = vpop.f32.mrf.mxu1 }
 0x2a6   :  { %v542_v16 = vadd.f32 %v565_v15, %v541_v5 }
 0x2a7   :  { %v739_v17 = vpop.f32.mrf.mxu1 }
 0x2a8   :  { %545 = vst [vmem:[#allocation5] sm:$0xff] %v542_v16 }
 0x2a9   :  { %777 = shalt.err (!%p774_p9)
}
 0x2aa   :  { %555 = dma.vmem_to_hbm [thread:$0]  %s553_s11, 128, %s1029_s7, [#allocation4]  }
 0x2ab   :  { %788 = dma.done.wait [#allocation4], 128  }
 0x2ac   :  { %789 = vsyncadd [#allocation4], 4294967168 }
 0x2ad   :  { %559 = vsyncpa [#allocation3], 1 }
 0x2ae   :  { %560 = vsyncpa [#allocation4], 1 }

</bundles_post_ra>
